<compile_context>
chip_gen: v7x
topology: tpu7x:2x2x1
jax: 0.10.0
libtpu: 0.0.40
codegen_flags: <defaults>
</compile_context>

<pallas_src>
import jax
import jax.numpy as jnp
from jax.experimental import pallas as pl
from jax.experimental.pallas import tpu as pltpu

WINDOW = 3  # kernel_size of the first Conv1d


def _round_up(x, m):
    return ((x + m - 1) // m) * m


def _tcn_kernel(x_ref, w1_ref, w2_ref, b2_ref, o_ref):
    """One lane tile of the flattened (batch x time) axis per grid step.

    x_ref  : (K_pad, T)        bf16 im2col'd input incl. ones row (bias1 fold)
    w1_ref : (H_pad, K_pad)    bf16 conv1 weights (tap-major K) + bias column
    w2_ref : (Cout_p, H_pad)   bf16 1x1-conv weights (zero-padded)
    b2_ref : (Cout_p, 1)       f32
    o_ref  : (Cout_p, T)       f32 output tile (lane-dense)
    """
    # Layer 1: Conv1d(k=3) + bias folded into a single MXU matmul, then ReLU.
    h = jnp.dot(w1_ref[...], x_ref[...], preferred_element_type=jnp.float32)
    h = jnp.maximum(h, 0.0)
    # Layer 2: 1x1 conv == dense projection; bias2 is a (Cout,1) broadcast add.
    out = jnp.dot(w2_ref[...], h.astype(w2_ref.dtype),
                  preferred_element_type=jnp.float32)
    o_ref[...] = (out + b2_ref[...]).astype(o_ref.dtype)


def sequence_initializer(x_ncl, w1, b1, w2, b2):
    """x_ncl: (N, nfeat, L) f32 -> (N, d_embed, L) f32 (matches the PyTorch module).

    w1: (d_hidden, nfeat, WINDOW)   (PyTorch Conv1d weight layout)
    b1: (d_hidden,)
    w2: (d_embed, d_hidden, 1)
    b2: (d_embed,)
    """
    N, cin, L = x_ncl.shape
    H = w1.shape[0]
    cout = w2.shape[0]

    K0 = WINDOW * cin                    # raw im2col channels
    K_pad = _round_up(K0 + 1, 16)        # +1 ones row (bias1), pad for bf16 packing
    H_pad = _round_up(H, 128)            # 200 -> 256: clean MXU K / unmasked lanes
    Cout_p = _round_up(cout, 8)          # sublane-aligned output rows
    L_pad = _round_up(L, 128)            # lane-dense stores for any L

    # --- im2col (causal, per sequence) + ones row, flattened onto lanes ------
    # x_im[k*cin + c, n*L_pad + t] = x[n, c, t + k - (WINDOW-1)]  (zeros left of t=0)
    x_padL = jnp.pad(x_ncl, ((0, 0), (0, 0), (WINDOW - 1, 0)))          # (N, Cin, L+2)
    x_im = jnp.concatenate([x_padL[:, :, k:k + L] for k in range(WINDOW)], axis=1)
    ones = jnp.ones((N, 1, L), x_ncl.dtype)                              # bias-1 row
    x_im = jnp.concatenate([x_im, ones], axis=1)                         # (N, K0+1, L)
    x_im = jnp.pad(x_im, ((0, 0), (0, K_pad - (K0 + 1)), (0, L_pad - L)))
    x_im = jnp.transpose(x_im, (1, 0, 2)).reshape(K_pad, N * L_pad)
    x_im = x_im.astype(jnp.bfloat16)                                     # (K_pad, N*L_pad)

    # --- weights: tap-major K, bias column appended, zero-padded, bf16 -------
    w1_k = jnp.transpose(w1, (0, 2, 1)).reshape(H, K0)                   # (H, K0)
    w1_k = jnp.concatenate([w1_k, b1.reshape(H, 1)], axis=1)             # (H, K0+1)
    w1_k = jnp.pad(w1_k, ((0, H_pad - H), (0, K_pad - (K0 + 1)))).astype(jnp.bfloat16)
    w2_k = jnp.pad(w2[:, :, 0], ((0, Cout_p - cout), (0, H_pad - H))).astype(jnp.bfloat16)
    b2_k = jnp.pad(b2, (0, Cout_p - cout)).reshape(Cout_p, 1).astype(jnp.float32)

    # --- lane tiling over the flattened batch*time axis ----------------------
    flat = N * L_pad                                   # multiple of 128
    T = min(512, flat)                                 # 128..512-lane tiles
    if flat > 128 and flat // T < 2:                   # give both v7x TCs a step
        T = max(128, ((flat // 2) // 128) * 128)
    n_tiles = -(-flat // T)
    flat_pad = n_tiles * T
    if flat_pad != flat:
        x_im = jnp.pad(x_im, ((0, 0), (0, flat_pad - flat)))

    out = pl.pallas_call(
        _tcn_kernel,
        # TODO(synk): switch out dtype to bf16 if downstream accepts it (halves
        # HBM write traffic, the dominant byte stream); kept f32 to match PyTorch.
        out_shape=jax.ShapeDtypeStruct((Cout_p, flat_pad), x_ncl.dtype),
        grid=(n_tiles,),
        in_specs=[
            pl.BlockSpec((K_pad, T), lambda t: (0, t)),
            pl.BlockSpec((H_pad, K_pad), lambda t: (0, 0)),
            pl.BlockSpec((Cout_p, H_pad), lambda t: (0, 0)),
            pl.BlockSpec((Cout_p, 1), lambda t: (0, 0)),
        ],
        out_specs=pl.BlockSpec((Cout_p, T), lambda t: (0, t)),
        compiler_params=pltpu.CompilerParams(
            dimension_semantics=("parallel",)),
    )(x_im, w1_k, w2_k, b2_k)

    # (Cout_p, flat_pad) -> (N, Cout, L): drop padding, unflatten, NCL layout.
    out = out[:cout, :flat].reshape(cout, N, L_pad)[:, :, :L]
    return jnp.transpose(out, (1, 0, 2))


def _reference(x_ncl, w1, b1, w2, b2):
    """Pure-JAX f32 reference mirroring the PyTorch module."""
    x_pad = jnp.pad(x_ncl, ((0, 0), (0, 0), (WINDOW - 1, 0)))  # causal left pad
    h = jax.lax.conv_general_dilated(
        x_pad, w1, window_strides=(1,), padding="VALID",
        dimension_numbers=("NCH", "OIH", "NCH")) + b1[None, :, None]
    h = jnp.maximum(h, 0.0)
    o = jax.lax.conv_general_dilated(
        h, w2, window_strides=(1,), padding="VALID",
        dimension_numbers=("NCH", "OIH", "NCH")) + b2[None, :, None]
    return o


if __name__ == "__main__":
    # Small shapes consistent with the module.
    N, nfeat, L = 2, 4, 8
    d_hidden, d_embed = 200, 32

    key = jax.random.PRNGKey(0)
    kx, k1, k2, k3, k4 = jax.random.split(key, 5)

    x = jax.random.normal(kx, (N, nfeat, L), dtype=jnp.float32)
    # Deterministic synthetic parameters (PyTorch Conv1d weight shapes).
    w1 = 0.1 * jax.random.normal(k1, (d_hidden, nfeat, WINDOW), dtype=jnp.float32)
    b1 = 0.1 * jax.random.normal(k2, (d_hidden,), dtype=jnp.float32)
    w2 = 0.1 * jax.random.normal(k3, (d_embed, d_hidden, 1), dtype=jnp.float32)
    b2 = 0.1 * jax.random.normal(k4, (d_embed,), dtype=jnp.float32)

    out = jax.block_until_ready(sequence_initializer(x, w1, b1, w2, b2))
    ref = jax.block_until_ready(_reference(x, w1, b1, w2, b2))

    assert out.shape == (N, d_embed, L), out.shape
    # bf16 operands with f32 accumulation -> looser tolerance than pure f32.
    max_err = float(jnp.max(jnp.abs(out - ref)))
    assert jnp.allclose(out, ref, atol=3e-2, rtol=3e-2), max_err
    print("KERNEL_OK")
</pallas_src>

<mosaic_0001>
module attributes {stable_mosaic.version = 11 : i64} {
  func.func @_tcn_kernel(%arg0: i32, %arg1: memref<16x128xbf16, #tpu.memory_space<vmem>>, %arg2: memref<256x16xbf16, #tpu.memory_space<vmem>>, %arg3: memref<32x256xbf16, #tpu.memory_space<vmem>>, %arg4: memref<32x1xf32, #tpu.memory_space<vmem>>, %arg5: memref<32x128xf32, #tpu.memory_space<vmem>>) attributes {dimension_semantics = [#tpu.dimension_semantics<parallel>], iteration_bounds = array<i64: 2>, scalar_prefetch = 0 : i64, scratch_operands = 0 : i64, tpu.core_type = #tpu.core_type<tc>, window_params = [{transform_indices = @transform_0, window_bounds = array<i64: 16, 128>}, {pipeline_mode = #tpu.pipeline_mode<synchronous>, transform_indices = @transform_1, window_bounds = array<i64: 256, 16>}, {pipeline_mode = #tpu.pipeline_mode<synchronous>, transform_indices = @transform_2, window_bounds = array<i64: 32, 256>}, {pipeline_mode = #tpu.pipeline_mode<synchronous>, transform_indices = @transform_3, window_bounds = array<i64: 32, 1>}, {transform_indices = @transform_4, window_bounds = array<i64: 32, 128>}]} {
    %c0 = arith.constant 0 : index
    %c0_0 = arith.constant 0 : index
    %0 = vector.load %arg2[%c0, %c0_0] : memref<256x16xbf16, #tpu.memory_space<vmem>>, vector<256x16xbf16>
    %c0_1 = arith.constant 0 : index
    %c0_2 = arith.constant 0 : index
    %1 = vector.load %arg1[%c0_1, %c0_2] : memref<16x128xbf16, #tpu.memory_space<vmem>>, vector<16x128xbf16>
    %cst = arith.constant dense<0.000000e+00> : vector<256x128xf32>
    %2 = tpu.matmul %0, %1, %cst {dimension_numbers = #tpu.dot_dimension_numbers<[1], [0], [0], [1], [0, 0, 1, 1], [], []>} : vector<256x16xbf16>, vector<16x128xbf16>, vector<256x128xf32> -> vector<256x128xf32>
    %cst_3 = arith.constant 0.000000e+00 : f32
    %3 = vector.broadcast %cst_3 : f32 to vector<256x128xf32>
    %4 = arith.maximumf %2, %3 : vector<256x128xf32>
    %c0_4 = arith.constant 0 : index
    %c0_5 = arith.constant 0 : index
    %5 = vector.load %arg3[%c0_4, %c0_5] : memref<32x256xbf16, #tpu.memory_space<vmem>>, vector<32x256xbf16>
    %6 = arith.truncf %4 : vector<256x128xf32> to vector<256x128xbf16>
    %cst_6 = arith.constant dense<0.000000e+00> : vector<32x128xf32>
    %7 = tpu.matmul %5, %6, %cst_6 {dimension_numbers = #tpu.dot_dimension_numbers<[1], [0], [0], [1], [0, 0, 1, 1], [], []>} : vector<32x256xbf16>, vector<256x128xbf16>, vector<32x128xf32> -> vector<32x128xf32>
    %c0_7 = arith.constant 0 : index
    %c0_8 = arith.constant 0 : index
    %8 = vector.load %arg4[%c0_7, %c0_8] : memref<32x1xf32, #tpu.memory_space<vmem>>, vector<32x1xf32>
    %9 = vector.broadcast %8 : vector<32x1xf32> to vector<32x128xf32>
    %10 = arith.addf %7, %9 : vector<32x128xf32>
    %c0_9 = arith.constant 0 : index
    %c0_10 = arith.constant 0 : index
    %11 = vector.load %arg5[%c0_9, %c0_10] : memref<32x128xf32, #tpu.memory_space<vmem>>, vector<32x128xf32>
    tpu.vector_store %arg5[%c0_9, %c0_10], %10 {strides = array<i32>} : memref<32x128xf32, #tpu.memory_space<vmem>>, vector<32x128xf32>,
    return
  }
  func.func @transform_0(%arg0: i32) -> (i32, i32) {
    %c0_i32 = arith.constant 0 : i32
    %c0_i32_0 = arith.constant 0 : i32
    return %c0_i32, %arg0 : i32, i32
  }
  func.func @transform_1(%arg0: i32) -> (i32, i32) {
    %c0_i32 = arith.constant 0 : i32
    %c0_i32_0 = arith.constant 0 : i32
    %c0_i32_1 = arith.constant 0 : i32
    return %c0_i32, %c0_i32_0 : i32, i32
  }
  func.func @transform_2(%arg0: i32) -> (i32, i32) {
    %c0_i32 = arith.constant 0 : i32
    %c0_i32_0 = arith.constant 0 : i32
    %c0_i32_1 = arith.constant 0 : i32
    return %c0_i32, %c0_i32_0 : i32, i32
  }
  func.func @transform_3(%arg0: i32) -> (i32, i32) {
    %c0_i32 = arith.constant 0 : i32
    %c0_i32_0 = arith.constant 0 : i32
    %c0_i32_1 = arith.constant 0 : i32
    return %c0_i32, %c0_i32_0 : i32, i32
  }
  func.func @transform_4(%arg0: i32) -> (i32, i32) {
    %c0_i32 = arith.constant 0 : i32
    %c0_i32_0 = arith.constant 0 : i32
    return %c0_i32, %arg0 : i32, i32
  }
}

</mosaic_0001>

<bundles_post_ra>
// kernel: tpu_custom_call.1
= control target key start
LH: loop header
LB: loop body
LE: loop exit
PB: predicated region body
PF: predicated region fallthrough
CT: control target
= control target key end

     0   :  { %9 = vsyncpa [#allocation4], 0  ;;  %s1292_s0 = inlined_call_operand.vmem [shape: bf16[16,256], index: 0, kind: input, shape index: {}]   ;;  %s1293_s1 = inlined_call_operand.vmem [shape: bf16[256,16], index: 1, kind: input, shape index: {}]   ;;  %s1294_s2 = inlined_call_operand.vmem [shape: bf16[32,256], index: 2, kind: input, shape index: {}]   ;;  %s1295_s3 = inlined_call_operand.vmem [shape: f32[32,1], index: 3, kind: input, shape index: {}]   ;;  %s1296_s4 = inlined_call_operand.hbm [shape: f32[32,256], index: 4, kind: output, shape index: {}]  }
   0x1   :  { %11 = vsyncpa [#allocation4 + $0x1], 0  ;;  %s1092_s15 = smov 0   ;;  %s1094_s16 = smov 0  }
   0x2   :  { %s1096_s17 = smov 0   ;;  %s1098_s18 = smov 0  }
   0x3 LB: > { %s801_s19 = sadd.s32 4294967295, %s1060_s18   ;;  %s802_s20 = sadd.s32 4294967294, %s1060_s18   ;;  %s1060_s18 = sphi %s1098_s18, %s1302_s18   ;;  %s1056_s17 = sphi %s1096_s17, %s1301_s17   ;;  %s1052_s16 = sphi %s1094_s16, %s1300_s16   ;;  %s1048_s15 = sphi %s1092_s15, %s1299_s15  }
   0x4   : > { %s1115_s21 = sadd.s32 1, %s1060_s18   ;;  %s24_s22 = sadd.s32 1, %s1056_s17 }
   0x5   : > { %s21_s23 = ssub.s32 %s1060_s18, %s1115_s21  ;;  %p31_p0 = scmp.ne.s32.totalorder %s1056_s17, %s1052_s16 }
   0x6   : > { %p22_p1 = scmp.eq.s32.totalorder %s21_s23, 0  ;;  %p32_p2 = scmp.eq.s32.totalorder %s1060_s18, 0 }
   0x7   : > { %p124_p3 = scmp.eq.s32.totalorder %s801_s19, 1  ;;  %p129_p4 = scmp.ne.s32.totalorder %s1052_s16, %s1048_s15 }
   0x8   : > { %s1128_s24 = scalar_select %p22_p1, %s1056_s17, %s24_s22  }
   0x9   : > { %p33_p5 = por %p32_p2, %p31_p0  ;;  %p1130_p6 = por %p124_p3, %p31_p0 }
   0xa   : > { %p130_p7 = scmp.eq.s32.totalorder %s802_s20, 1  ;;  %p804_p9 = scmp.ge.s32.totalorder %s1060_s18, 2 }
   0xc   : > { %p1134_p8 = por %p130_p7, %p129_p4  ;;  %155 = sbr.rel (%p804_p9) target bundleno = 26 (0x1a), region = 28 }
  0x13   : > { %158 = sbr.rel (!%p33_p5) target bundleno = 26 (0x1a), region = 32  ;;  %s160_s27 = sand.u32 (%p33_p5), 1, %s1056_s17  }
  0x14   : > { %s806_s28 = sshll.u32 (%p33_p5), %s1060_s18, 2  ;;  %s805_s29 = sshll.u32 (%p33_p5), %s160_s27, 3 }
  0x15   : > { %s164_s6 = scalar_lea.vmem (%p33_p5), %s1292_s0, %s806_s28  ;;  %s162_s7 = scalar_lea.vmem (%p33_p5), [#allocation2], %s805_s29 }
  0x16   : > { %v180_v0 = vld [vmem:[%s164_s6] sm:$0xf] (%p33_p5)  ;;  %v182_v1 = vld [vmem:[%s164_s6 + $0x8] sm:$0xf] (%p33_p5) }
  0x17   : > { %181 = vst [vmem:[%s162_s7] sm:$0xf] (%p33_p5), %v180_v0  ;;  %183 = vst [vmem:[%s162_s7 + $0x4] sm:$0xf] (%p33_p5), %v182_v1 }
  0x1a PF: > { %p807_p10 = scmp.ge.s32.totalorder %s1060_s18, 1  ;;  %p209_p11 = scmp.lt.s32.totalorder %s1060_s18, 3 }
  0x1c   : > { %p210_p12 = pnand %p807_p10, %p209_p11 }
  0x1d   : > { %s1149_s8 = sand.u32 (!%p210_p12), 1, %s1052_s16   ;;  %v976_v2 = vld [vmem:[%s1293_s1] sm:$0xff] (!%p210_p12)   ;;  %vm362_vm0 = vcmask (!%p210_p12), 130048   ;;  %v977_v4 = vld [vmem:[%s1293_s1 + $0x8] sm:$0xff] (!%p210_p12)   ;;  %v978_v5 = vld [vmem:[%s1293_s1 + $0x10] sm:$0xff] (!%p210_p12)   ;;  %v1062_v22 = vmov (!%p210_p12), 0  }
  0x1e   : > { %213 = sbr.rel (%p210_p12) target bundleno = 563 (0x233), region = 73  ;;  %s808_s11 = sshll.u32 (!%p210_p12), %s1149_s8, 3  ;;  %898 = vmatprep.mubr.msk.bf16.mxu0 (!%p210_p12), %vm362_vm0, %v976_v2  ;;  %v979_v6 = vld [vmem:[%s1293_s1 + $0x18] sm:$0xff] (!%p210_p12)   ;;  %v980_v7 = vld [vmem:[%s1293_s1 + $0x20] sm:$0xff] (!%p210_p12)   ;;  %v981_v8 = vld [vmem:[%s1293_s1 + $0x28] sm:$0xff] (!%p210_p12)   ;;  %973 = vset.pattern.permute.xlu0 (!%p210_p12), %v1062_v22 }
  0x1f   : > { %s218_s12 = scalar_lea.vmem (!%p210_p12), [#allocation2], %s808_s11  ;;  %v982_v9 = vld [vmem:[%s1293_s1 + $0x30] sm:$0xff] (!%p210_p12)   ;;  %v983_v10 = vld [vmem:[%s1293_s1 + $0x38] sm:$0xff] (!%p210_p12)   ;;  %v984_v11 = vld [vmem:[%s1293_s1 + $0x40] sm:$0xff] (!%p210_p12)   ;;  %974 = vset.pattern.permute.xlu1 (!%p210_p12), %v1062_v22  ;;  %s809_s11 = sshll.u32 (!%p210_p12), %s1149_s8, 5 }
  0x20   : > { %v975_v3 = vld [vmem:[%s218_s12] sm:$0xff] (!%p210_p12)   ;;  %v986_v13 = vld [vmem:[%s1293_s1 + $0x50] sm:$0xff] (!%p210_p12)   ;;  %v987_v14 = vld [vmem:[%s1293_s1 + $0x58] sm:$0xff] (!%p210_p12)   ;;  %s240_s12 = scalar_lea.vmem (!%p210_p12), [#allocation3], %s809_s11  ;;  %s848_s14 = sshll.u32 (!%p210_p12), %s801_s19, 7 }
  0x21   : > { %896 = vmatprep.subr.bf16.mxu0 (!%p210_p12), %v975_v3  ;;  %v985_v12 = vld [vmem:[%s1293_s1 + $0x48] sm:$0xff] (!%p210_p12)   ;;  %v988_v15 = vld [vmem:[%s1293_s1 + $0x60] sm:$0xff] (!%p210_p12)   ;;  %v990_v17 = vld [vmem:[%s1293_s1 + $0x70] sm:$0xff] (!%p210_p12)   ;;  %s734_s13 = sshll.u32 (!%p210_p12), %s240_s12, 4  ;;  %s1248_s23 = scalar_lea.hbm (!%p210_p12), %s1296_s4, %s848_s14  ;;  %s1243_s13 = int_to_ptr.vmem [resolvable:$true] %s734_s13 }
  0x22   : > { %897 = vmatpush3.bf16.msra.mxu0 (!%p210_p12), %v975_v3  ;;  %v989_v16 = vld [vmem:[%s1293_s1 + $0x68] sm:$0xff] (!%p210_p12)   ;;  %v991_v18 = vld [vmem:[%s1293_s1 + $0x78] sm:$0xff] (!%p210_p12)   ;;  %v624_v20 = vld [vmem:[%s1295_s3] sm:$0xff] (!%p210_p12)  ;;  %s722_s27 = scalar_lea.sflag (!%p210_p12), [#allocation4], %s1149_s8  ;;  %s998_s28 = scalar_lea.vmem (!%p210_p12), %s1243_s13, 512 }
  0x23   : > { %v994_v19 = vld [vmem:[%s1294_s2 + $0x4] ss:$8 sps:$4 sm:$0xff] (!%p210_p12)   ;;  %v626_v21 = vld [vmem:[%s1295_s3 + $0x10] sm:$0xff] (!%p210_p12)  ;;  %630 = vperm.xlu0 (!%p210_p12), %973, %v624_v20   ;;  %v627_v24 = vld [vmem:[%s1295_s3 + $0x18] sm:$0xff] (!%p210_p12)  ;;  %p999_p13 = scmp.ne.s32.totalorder (!%p210_p12), %s1243_s13, %s998_s28  ;;  %s1063_s19 = smov (!%p210_p12), [#allocation3]  }
  0x24   : > { %700 = vmatprep.mubr.bf16.mxu1 (!%p210_p12), %v994_v19  ;;  %640 = vperm.xlu1 (!%p210_p12), %974, %v626_v21   ;;  %v625_v23 = vld [vmem:[%s1295_s3 + $0x8] sm:$0xff] (!%p210_p12)  ;;  %s1002_s29 = sshll.u32 (!%p210_p12), %s1063_s19, 4  ;;  %s1003_s29 = int_to_ptr.vmem [resolvable:$false] %s1002_s29 }
  0x25   : > { %899 = vmatmul.mubr.msk.bf16.vlgmr.msra.gmra.mrb[0].mxu0 %vm362_vm0, %v977_v4  ;;  %p1000_p0 = pnand %p999_p13, %p1130_p6  ;;  %s1004_s30 = scalar_lea.vmem %s1003_s29, 1024 }
  0x26   : > { %902 = vmatprep.mubr.msk.bf16.mxu0 %vm362_vm0, %v978_v5  ;;  %p1005_p2 = scmp.lt.s32.totalorder %s1243_s13, %s1003_s29  ;;  %p1006_p3 = scmp.lt.s32.totalorder %s1004_s30, %s998_s28 }
  0x27   : > { %635 = vperm.xlu0 %973, %v625_v23   ;;  %p1001_p1 = pneg %p1000_p0 }
  0x28   : > { %645 = vperm.xlu1 %974, %v627_v24   ;;  %p1007_p4 = por %p1006_p3, %p1005_p2 }
  0x2a   : > { %p1008_p5 = pnand %p1007_p4, %p1001_p1 }
  0x2d   : > { %903 = vmatmul.mubr.msk.bf16.gmra.mrb[4].mxu0 %vm362_vm0, %v979_v6 }
  0x2e   : > { %906 = vmatprep.mubr.msk.bf16.mxu0 %vm362_vm0, %v980_v7 }
  0x35   : > { %907 = vmatmul.mubr.msk.bf16.gmra.mrb[8].mxu0 %vm362_vm0, %v981_v8 }
  0x36   : > { %910 = vmatprep.mubr.msk.bf16.mxu0 %vm362_vm0, %v982_v9 }
  0x3d   : > { %911 = vmatmul.mubr.msk.bf16.gmra.mrb[12].mxu0 %vm362_vm0, %v983_v10 }
  0x3e   : > { %914 = vmatprep.mubr.msk.bf16.mxu0 %vm362_vm0, %v984_v11 }
  0x45   : > { %915 = vmatmul.mubr.msk.bf16.gmra.mrb[16].mxu0 %vm362_vm0, %v985_v12 }
  0x46   : > { %918 = vmatprep.mubr.msk.bf16.mxu0 %vm362_vm0, %v986_v13 }
  0x4d   : > { %919 = vmatmul.mubr.msk.bf16.gmra.mrb[20].mxu0 %vm362_vm0, %v987_v14 }
  0x4e   : > { %922 = vmatprep.mubr.msk.bf16.mxu0 %vm362_vm0, %v988_v15 }
  0x55   : > { %923 = vmatmul.mubr.msk.bf16.gmra.mrb[24].mxu0 %vm362_vm0, %v989_v16 }
  0x56   : > { %926 = vmatprep.mubr.msk.bf16.mxu0 %vm362_vm0, %v990_v17 }
  0x5d   : > { %927 = vmatmul.mubr.msk.bf16.gmra.mrb[28].mxu0 %vm362_vm0, %v991_v18 }
  0xf8   : > { %v900_v25 = vpop.f32.mrb[0].mxu0 }
  0xf9   : > { %v445_v26 = vpop.f32.mrb[1].mxu0  ;;  %v574_v28 = vmax.f32 %v900_v25, 0.0 }
  0xfa   : > { %v901_v27 = vpop.f32.mrb[2].mxu0  ;;  %v572_v31 = vmax.f32 %v445_v26, 0.0 }
  0xfb   : > { %v575_v29 = vmax.f32 %v901_v27, 0.0  ;;  %v448_v30 = vpop.f32.mrb[3].mxu0 }
  0xfc   : > { %v573_v32 = vmax.f32 %v448_v30, 0.0 }
  0xfd   : > { %v609_v33 = vpack.c.bf16 %v575_v29, %v574_v28 }
  0xfe   : > { %v608_v34 = vpack.c.bf16 %v573_v32, %v572_v31 }
 0x100   : > { %v904_v35 = vpop.f32.mrb[4].mxu0 }
 0x101   : > { %v461_v36 = vpop.f32.mrb[5].mxu0  ;;  %v578_v38 = vmax.f32 %v904_v35, 0.0 }
 0x102   : > { %v905_v37 = vpop.f32.mrb[6].mxu0  ;;  %v576_v41 = vmax.f32 %v461_v36, 0.0 }
 0x103   : > { %v579_v39 = vmax.f32 %v905_v37, 0.0  ;;  %v464_v40 = vpop.f32.mrb[7].mxu0 }
 0x104   : > { %v577_v42 = vmax.f32 %v464_v40, 0.0 }
 0x105   : > { %v611_v43 = vpack.c.bf16 %v579_v39, %v578_v38 }
 0x106   : > { %v610_v44 = vpack.c.bf16 %v577_v42, %v576_v41  ;;  %v992_v41 = vld [vmem:[%s1294_s2] ss:$8 sps:$4 sm:$0xff]   ;;  %v995_v42 = vld [vmem:[%s1294_s2 + $0x14] ss:$8 sps:$4 sm:$0xff]  }
 0x108   : > { %v908_v45 = vpop.f32.mrb[8].mxu0 }
 0x109   : > { %v477_v46 = vpop.f32.mrb[9].mxu0  ;;  %v582_v48 = vmax.f32 %v908_v45, 0.0 }
 0x10a   : > { %v909_v47 = vpop.f32.mrb[10].mxu0  ;;  %v580_v51 = vmax.f32 %v477_v46, 0.0 }
 0x10b   : > { %v583_v49 = vmax.f32 %v909_v47, 0.0  ;;  %v480_v50 = vpop.f32.mrb[11].mxu0 }
 0x10c   : > { %v581_v52 = vmax.f32 %v480_v50, 0.0 }
 0x10d   : > { %v613_v53 = vpack.c.bf16 %v583_v49, %v582_v48 }
 0x10e   : > { %v612_v54 = vpack.c.bf16 %v581_v52, %v580_v51 }
 0x110   : > { %v912_v55 = vpop.f32.mrb[12].mxu0 }
 0x111   : > { %v493_v56 = vpop.f32.mrb[13].mxu0  ;;  %v586_v58 = vmax.f32 %v912_v55, 0.0 }
 0x112   : > { %v913_v57 = vpop.f32.mrb[14].mxu0  ;;  %v584_v61 = vmax.f32 %v493_v56, 0.0 }
 0x113   : > { %v587_v59 = vmax.f32 %v913_v57, 0.0  ;;  %v496_v60 = vpop.f32.mrb[15].mxu0 }
 0x114   : > { %v585_v62 = vmax.f32 %v496_v60, 0.0 }
 0x115   : > { %v615_v63 = vpack.c.bf16 %v587_v59, %v586_v58 }
 0x116   : > { %v614_v0 = vpack.c.bf16 %v585_v62, %v584_v61 }
 0x118   : > { %v916_v1 = vpop.f32.mrb[16].mxu0 }
 0x119   : > { %v509_v2 = vpop.f32.mrb[17].mxu0  ;;  %v590_v4 = vmax.f32 %v916_v1, 0.0 }
 0x11a   : > { %v917_v3 = vpop.f32.mrb[18].mxu0  ;;  %v588_v7 = vmax.f32 %v509_v2, 0.0 }
 0x11b   : > { %v591_v5 = vmax.f32 %v917_v3, 0.0  ;;  %v512_v6 = vpop.f32.mrb[19].mxu0 }
 0x11c   : > { %v589_v8 = vmax.f32 %v512_v6, 0.0 }
 0x11d   : > { %v617_v9 = vpack.c.bf16 %v591_v5, %v590_v4 }
 0x11e   : > { %v616_v10 = vpack.c.bf16 %v589_v8, %v588_v7 }
 0x120   : > { %v920_v11 = vpop.f32.mrb[20].mxu0  ;;  %868 = vmatprep.subr.bf16.mxu1 %v616_v10 }
 0x121   : > { %v525_v12 = vpop.f32.mrb[21].mxu0  ;;  %869 = vmatpush3.bf16.msra.mxu1 %v608_v34  ;;  %v594_v14 = vmax.f32 %v920_v11, 0.0 }
 0x122   : > { %v921_v13 = vpop.f32.mrb[22].mxu0  ;;  %870 = vmatprep.subr.bf16.mxu1 %v617_v9  ;;  %v592_v17 = vmax.f32 %v525_v12, 0.0 }
 0x123   : > { %v595_v15 = vmax.f32 %v921_v13, 0.0  ;;  %v528_v16 = vpop.f32.mrb[23].mxu0 }
 0x124   : > { %v593_v18 = vmax.f32 %v528_v16, 0.0 }
 0x125   : > { %v619_v19 = vpack.c.bf16 %v595_v15, %v594_v14  ;;  %871 = vmatpush3.bf16.msra.mxu1 %v609_v33 }
 0x126   : > { %v618_v20 = vpack.c.bf16 %v593_v18, %v592_v17 }
 0x128   : > { %v924_v21 = vpop.f32.mrb[24].mxu0  ;;  %872 = vmatprep.subr.bf16.mxu1 %v618_v20 }
 0x129   : > { %v541_v22 = vpop.f32.mrb[25].mxu0  ;;  %873 = vmatpush3.bf16.msra.mxu1 %v610_v44  ;;  %v598_v24 = vmax.f32 %v924_v21, 0.0  ;;  %v631_v44 = vpop.permute.xlu0 %630 }
 0x12a   : > { %v925_v23 = vpop.f32.mrb[26].mxu0  ;;  %874 = vmatprep.subr.bf16.mxu1 %v619_v19  ;;  %v596_v27 = vmax.f32 %v541_v22, 0.0 }
 0x12b   : > { %v599_v25 = vmax.f32 %v925_v23, 0.0  ;;  %v544_v26 = vpop.f32.mrb[27].mxu0 }
 0x12c   : > { %v597_v28 = vmax.f32 %v544_v26, 0.0 }
 0x12d   : > { %v621_v29 = vpack.c.bf16 %v599_v25, %v598_v24  ;;  %875 = vmatpush3.bf16.msra.mxu1 %v611_v43  ;;  %v997_v43 = vld [vmem:[%s1294_s2 + $0x10] ss:$8 sps:$4 sm:$0xff]   ;;  %v636_v50 = vpop.permute.xlu0 %635 }
 0x12e   : > { %v620_v30 = vpack.c.bf16 %v597_v28, %v596_v27 }
 0x130   : > { %v928_v31 = vpop.f32.mrb[28].mxu0  ;;  %876 = vmatprep.subr.bf16.mxu1 %v620_v30 }
 0x131   : > { %v557_v32 = vpop.f32.mrb[29].mxu0  ;;  %877 = vmatpush3.bf16.msra.mxu1 %v612_v54  ;;  %v602_v34 = vmax.f32 %v928_v31, 0.0  ;;  %v641_v54 = vpop.permute.xlu1 %640 }
 0x132   : > { %v929_v33 = vpop.f32.mrb[30].mxu0  ;;  %878 = vmatprep.subr.bf16.mxu1 %v621_v29  ;;  %v600_v37 = vmax.f32 %v557_v32, 0.0 }
 0x133   : > { %v603_v35 = vmax.f32 %v929_v33, 0.0  ;;  %v560_v36 = vpop.f32.mrb[31].mxu0 }
 0x134   : > { %v601_v38 = vmax.f32 %v560_v36, 0.0 }
 0x135   : > { %v623_v39 = vpack.c.bf16 %v603_v35, %v602_v34  ;;  %879 = vmatpush3.bf16.msra.mxu1 %v613_v53  ;;  %v646_v62 = vpop.permute.xlu1 %645 }
 0x136   : > { %v622_v40 = vpack.c.bf16 %v601_v38, %v600_v37 }
 0x138   : > { %880 = vmatprep.subr.bf16.mxu1 %v622_v40 }
 0x139   : > { %881 = vmatpush3.bf16.msra.mxu1 %v614_v0 }
 0x13a   : > { %882 = vmatprep.subr.bf16.mxu1 %v623_v39 }
 0x13d   : > { %883 = vmatpush3.bf16.msra.mxu1 %v615_v63 }
 0x140   : > { %701 = vmatmul.mubr.bf16.vlgmr.msra.gmra.mrb[0].mxu1 %v992_v41 }
 0x141   : > { %708 = vmatprep.mubr.bf16.mxu1 %v995_v42 }
 0x148   : > { %709 = vmatmul.mubr.bf16.gmra.mrb[4].mxu1 %v997_v43 }
 0x213   : > { %v884_v45 = vpop.f32.mrb[0].mxu1 }
 0x214   : > { %v885_v46 = vpop.f32.mrb[1].mxu1 }
 0x215   : > { %v886_v47 = vadd.f32 %v885_v46, %v884_v45  ;;  %v887_v48 = vpop.f32.mrb[2].mxu1 }
 0x216   : > { %v888_v49 = vpop.f32.mrb[3].mxu1 }
 0x217   : > { %v703_v51 = vadd.f32 %v886_v47, %v631_v44  ;;  %v889_v52 = vadd.f32 %v888_v49, %v887_v48 }
 0x219   : > { %717 = vst [vmem:[%s240_s12] sm:$0xff] %v703_v51  ;;  %v706_v53 = vadd.f32 %v889_v52, %v636_v50 }
 0x21b   : > { %718 = vst [vmem:[%s240_s12 + $0x8] sm:$0xff] %v706_v53  ;;  %v890_v55 = vpop.f32.mrb[4].mxu1 }
 0x21c   : > { %v891_v56 = vpop.f32.mrb[5].mxu1 }
 0x21d   : > { %v892_v57 = vadd.f32 %v891_v56, %v890_v55  ;;  %v893_v58 = vpop.f32.mrb[6].mxu1 }
 0x21e   : > { %v894_v59 = vpop.f32.mrb[7].mxu1 }
 0x21f   : > { %v711_v60 = vadd.f32 %v892_v57, %v641_v54  ;;  %v895_v61 = vadd.f32 %v894_v59, %v893_v58 }
 0x221   : > { %719 = vst [vmem:[%s240_s12 + $0x10] sm:$0xff] %v711_v60  ;;  %v714_v63 = vadd.f32 %v895_v61, %v646_v62 }
 0x223   : > { %720 = vst [vmem:[%s240_s12 + $0x18] sm:$0xff] %v714_v63 }
 0x224   : > { %1011 = shalt.err (!%p1008_p5)
}
 0x225   : > { %s1012_s5 = scalar_lea.hbm %s1248_s23, 512  ;;  %s1016_s9 = scalar_lea.hbm %s1296_s4, 1024 }
 0x226   : > { %p1013_p7 = scmp.ne.s32.totalorder %s1248_s23, %s1012_s5  ;;  %p1017_p12 = scmp.lt.u32.totalorder %s1248_s23, %s1296_s4 }
 0x227   : > { %p1018_p13 = scmp.lt.u32.totalorder %s1016_s9, %s1012_s5  ;;  %p1020_p1 = scmp.lt.u32.totalorder %s1012_s5, %s1248_s23 }
 0x228   : > { %p1014_p10 = pnand %p1013_p7, %p1130_p6 }
 0x229   : > { %p1019_p0 = por %p1018_p13, %p1017_p12 }
 0x22a   : > { %p1015_p11 = pneg %p1014_p10 }
 0x22b   : > { %p1021_p2 = por %p1020_p1, %p1019_p0 }
 0x22d   : > { %p1022_p3 = pnand %p1021_p2, %p1015_p11 }
 0x22f   : > { %1025 = shalt.err (!%p1022_p3)
}
 0x230   : > { %s1064_s12 = smov 128   ;;  %s1065_s14 = smov 256  }
 0x231   : > { %s1066_s20 = smov 8  }
 0x232   : > { %930 = dma.vmem_to_hbm [thread:$0]  (%p1130_p6), %s1243_s13, 512, %s1248_s23, %s722_s27, %s1064_s12, %s1065_s14, %s1066_s20  }
 0x233 PF: > { %s749_s22 = sand.u32 1, %s1048_s15   ;;  %p933_p4 = pnand %p804_p9, %p1134_p8 }
 0x234   : > { %s750_s28 = scalar_lea.sflag [#allocation4], %s749_s22 }
 0x235   : > { %1043 = dma.done.wait (!%p933_p4), %s750_s28, 512  }
 0x236   : > { %1045 = vsyncadd (!%p933_p4), %s750_s28, 4294966784  ;;  %p14_p5 = scmp.ge.s32.totalorder %s1115_s21, 4   ;;  %s1299_s15 = smov %s1052_s16 }
 0x237   : > { %s1300_s16 = smov %s1056_s17  ;;  %s1301_s17 = smov %s1128_s24 }
 0x238   : > { %s1302_s18 = smov %s1115_s21  ;;  %16 = sbr.rel (!%p14_p5) target bundleno = 3 (0x3), region = 117 }
 0x23f   :  { %755 = vsyncpa [#allocation4], 1 }
 0x240   :  { %757 = vsyncpa [#allocation4 + $0x1], 1 }

</bundles_post_ra>
